<compile_context>
chip_gen: v7x
topology: tpu7x:2x2x1
jax: 0.10.0
libtpu: 0.0.40
codegen_flags: <defaults>
</compile_context>

<pallas_src>
import functools

import jax
import jax.numpy as jnp
from jax import lax
from jax.experimental import pallas as pl
from jax.experimental.pallas import tpu as pltpu

_MASK = -1e30          # "minus infinity" for masked (padded) rows
_LANE = 128            # TPU lane width
_SUBLANE = 8           # f32 sublane width


def _round_up(x, m):
    return (x + m - 1) // m * m


def _stu_fusion_kernel(self_emb_ref, wa_emb_ref, emb_ref, wf_t_ref, out_ref,
                       m_ref, l_ref, acc_ref, *, n_valid, block_n):
    i = pl.program_id(0)
    n_steps = pl.num_programs(0)

    @pl.when(i == 0)
    def _init():
        m_ref[...] = jnp.full(m_ref.shape, _MASK, dtype=m_ref.dtype)
        l_ref[...] = jnp.zeros_like(l_ref)
        acc_ref[...] = jnp.zeros_like(acc_ref)

    emb = emb_ref[...]                                           # (TN, Kp)

    # logits laid out along lanes: (1, TN) = wa_emb (1, Kp) . emb^T  (MXU, NT).
    s = lax.dot_general(wa_emb_ref[...], emb,
                        (((1,), (1,)), ((), ())),
                        preferred_element_type=jnp.float32)      # (1, TN)
    # (self_emb . wa_self + bias) is identical for every row, hence
    # shift-invariant under softmax(dim=0) and intentionally omitted.

    lane = lax.broadcasted_iota(jnp.int32, s.shape, 1)
    s = jnp.where(i * block_n + lane < n_valid, s, _MASK)        # ragged mask

    # fusion_layer(emb) = emb @ W_f.T   (MXU NN, f32 accumulation).
    fusion = jnp.dot(emb, wf_t_ref[...],
                     preferred_element_type=jnp.float32)         # (TN, Dp)

    # ---- online softmax over the N axis ----
    m_prev = m_ref[...]                                          # (1, 1)
    m_new = jnp.maximum(m_prev, jnp.max(s, axis=1, keepdims=True))
    alpha = jnp.exp(m_prev - m_new)                              # (1, 1)
    p = jnp.exp(s - m_new)                                       # (1, TN); masked -> 0
    l_ref[...] = alpha * l_ref[...] + jnp.sum(p, axis=1, keepdims=True)
    # attention-weighted row sum as an MXU matmul (1,TN) @ (TN,Dp).
    acc_ref[...] = alpha * acc_ref[...] + jnp.dot(
        p, fusion, preferred_element_type=jnp.float32)           # (1, Dp)
    m_ref[...] = m_new

    @pl.when(i == n_steps - 1)
    def _finalize():
        inv_l = pl.reciprocal(l_ref[...], approx=True)           # EUP reciprocal
        out_ref[...] = (acc_ref[...] * inv_l
                        + self_emb_ref[...]).astype(out_ref.dtype)


def stu_fusion_forward(self_emb, emb, wf, wa, ba, *, block_n=128,
                       compute_dtype=jnp.float32):
    """self_emb: (1, D); emb: (N, D); wf: (D, D) torch Linear weight (out, in);
    wa: (1, 2D) attention weight; ba: (1,) attention bias.
    (ba and the wa_self half only shift every logit equally -> cancel in the
     dim=0 softmax, so they do not enter the kernel.)"""
    n, d = emb.shape
    del ba  # constant shift, cancels in softmax over dim 0

    kp = max(_round_up(d, _LANE), _LANE)     # padded contraction dim (lanes)
    dp = kp                                  # padded output dim (lanes)
    tn = _round_up(min(block_n, _round_up(n, _SUBLANE)), _SUBLANE)
    n_steps = pl.cdiv(n, tn)
    n_pad = n_steps * tn

    # lane-dense padded operands (weight transpose+pad fuses into one XLA copy)
    emb_p = jnp.zeros((n_pad, kp), compute_dtype).at[:n, :d].set(
        emb.astype(compute_dtype))
    wf_t_p = jnp.zeros((kp, dp), compute_dtype).at[:d, :d].set(
        wf.T.astype(compute_dtype))
    wa_emb_p = jnp.zeros((1, kp), compute_dtype).at[:, :d].set(
        wa[:, d:].astype(compute_dtype))
    se_p = jnp.zeros((1, dp), jnp.float32).at[:, :d].set(
        self_emb.astype(jnp.float32))

    itemsize = jnp.dtype(compute_dtype).itemsize
    vmem_bytes = (2 * tn * kp * itemsize       # double-buffered emb tiles
                  + 2 * kp * dp * itemsize     # resident weight tile
                  + 2 * kp * itemsize          # wa_emb
                  + 4 * dp * 4                 # self_emb + acc + out
                  + (4 << 20))                 # headroom
    cost = pl.CostEstimate(
        flops=2 * n * d * d + 4 * n * d,
        transcendentals=n + 2 * n_steps,
        bytes_accessed=(emb_p.size + wf_t_p.size + wa_emb_p.size) * itemsize
                       + (se_p.size + dp) * 4,
    )

    kernel = functools.partial(_stu_fusion_kernel, n_valid=n, block_n=tn)
    out_p = pl.pallas_call(
        kernel,
        out_shape=jax.ShapeDtypeStruct((1, dp), jnp.float32),
        grid_spec=pltpu.PrefetchScalarGridSpec(
            num_scalar_prefetch=0,
            grid=(n_steps,),
            in_specs=[
                pl.BlockSpec((1, dp), lambda i: (0, 0)),    # self_emb (resident)
                pl.BlockSpec((1, kp), lambda i: (0, 0)),    # wa_emb   (resident)
                pl.BlockSpec((tn, kp), lambda i: (i, 0)),   # emb tile (pipelined)
                pl.BlockSpec((kp, dp), lambda i: (0, 0)),   # wf_t     (resident)
            ],
            out_specs=pl.BlockSpec((1, dp), lambda i: (0, 0)),
            scratch_shapes=[
                pltpu.VMEM((1, 1), jnp.float32),    # running max m
                pltpu.VMEM((1, 1), jnp.float32),    # running normalizer l
                pltpu.VMEM((1, dp), jnp.float32),   # running weighted sum
            ],
        ),
        compiler_params=pltpu.CompilerParams(
            # the single grid axis is the softmax reduction -> "arbitrary".
            dimension_semantics=("arbitrary",),
            vmem_limit_bytes=min(max(vmem_bytes, 8 << 20), 32 << 20),
        ),
        cost_estimate=cost,
    )(se_p, wa_emb_p, emb_p, wf_t_p)

    return out_p[:, :d].astype(self_emb.dtype)


def stu_fusion_reference(self_emb, emb, wf, wa, ba):
    # plain-JAX transcription of the PyTorch module, for correctness check
    fusion_out = emb @ wf.T
    n = emb.shape[0]
    se_rep = jnp.tile(self_emb, (n, 1))
    atte_in = jnp.concatenate([se_rep, emb], axis=1)
    logits = atte_in @ wa.T + ba
    att = jax.nn.softmax(logits, axis=0)
    res = jnp.sum(att * fusion_out, axis=0).reshape(1, -1)
    return res + self_emb


if __name__ == "__main__":
    D = 6     # emb_dim (module default)
    N = 300   # neighbours fused over; exercises multi-tile online softmax
              # with a ragged last tile (300 = 128 + 128 + 44)

    key = jax.random.PRNGKey(0)
    k1, k2, k3, k4, k5 = jax.random.split(key, 5)

    self_emb = jax.random.normal(k1, (1, D), dtype=jnp.float32)
    emb = jax.random.normal(k2, (N, D), dtype=jnp.float32)
    wf = jax.random.normal(k3, (D, D), dtype=jnp.float32) * 0.1     # fusion_layer.weight (out, in)
    wa = jax.random.normal(k4, (1, 2 * D), dtype=jnp.float32) * 0.1  # attention_inside_layer.weight
    ba = jax.random.normal(k5, (1,), dtype=jnp.float32) * 0.1        # attention_inside_layer.bias

    ref = stu_fusion_reference(self_emb, emb, wf, wa, ba)

    # f32 path (multi-tile, ragged last tile)
    out = jax.block_until_ready(stu_fusion_forward(self_emb, emb, wf, wa, ba))
    assert out.shape == (1, D)
    assert jnp.allclose(out, ref, atol=2e-3, rtol=2e-3), (out, ref)

    # bf16 weights/activations (halves the bandwidth-bound DxD / emb reads),
    # f32 accumulation and f32 softmax math kept inside the kernel.
    out_bf16 = jax.block_until_ready(
        stu_fusion_forward(self_emb, emb, wf, wa, ba,
                           compute_dtype=jnp.bfloat16))
    assert jnp.allclose(out_bf16, ref, atol=5e-2, rtol=5e-2), (out_bf16, ref)

    # single-tile path (N < block_n)
    out_small = jax.block_until_ready(
        stu_fusion_forward(self_emb, emb[:8], wf, wa, ba))
    ref_small = stu_fusion_reference(self_emb, emb[:8], wf, wa, ba)
    assert jnp.allclose(out_small, ref_small, atol=2e-3, rtol=2e-3), (out_small, ref_small)

    print("KERNEL_OK")
</pallas_src>

<mosaic_0001>
module attributes {stable_mosaic.version = 11 : i64} {
  func.func @_stu_fusion_kernel(%arg0: i32, %arg1: memref<1x128xf32, #tpu.memory_space<vmem>>, %arg2: memref<1x128xf32, #tpu.memory_space<vmem>>, %arg3: memref<128x128xf32, #tpu.memory_space<vmem>>, %arg4: memref<128x128xf32, #tpu.memory_space<vmem>>, %arg5: memref<1x128xf32, #tpu.memory_space<vmem>>, %arg6: memref<1x1xf32, #tpu.memory_space<vmem>>, %arg7: memref<1x1xf32, #tpu.memory_space<vmem>>, %arg8: memref<1x128xf32, #tpu.memory_space<vmem>>) attributes {dimension_semantics = [#tpu.dimension_semantics<arbitrary>], iteration_bounds = array<i64: 3>, scalar_prefetch = 0 : i64, scratch_operands = 3 : i64, tpu.core_type = #tpu.core_type<tc>, window_params = [{pipeline_mode = #tpu.pipeline_mode<synchronous>, transform_indices = @transform_0, window_bounds = array<i64: 1, 128>}, {pipeline_mode = #tpu.pipeline_mode<synchronous>, transform_indices = @transform_1, window_bounds = array<i64: 1, 128>}, {transform_indices = @transform_2, window_bounds = array<i64: 128, 128>}, {pipeline_mode = #tpu.pipeline_mode<synchronous>, transform_indices = @transform_3, window_bounds = array<i64: 128, 128>}, {pipeline_mode = #tpu.pipeline_mode<synchronous>, transform_indices = @transform_4, window_bounds = array<i64: 1, 128>}]} {
    %c0_i32 = arith.constant 0 : i32
    %0 = arith.cmpi eq, %arg0, %c0_i32 : i32
    %1 = arith.extui %0 : i1 to i32
    %c0_i32_0 = arith.constant 0 : i32
    %2 = arith.cmpi ne, %1, %c0_i32_0 : i32
    scf.if %2 {
      %cst_24 = arith.constant -1.000000e+30 : f32
      %41 = vector.broadcast %cst_24 : f32 to vector<1x1xf32>
      %c0_25 = arith.constant 0 : index
      %c0_26 = arith.constant 0 : index
      %42 = vector.load %arg6[%c0_25, %c0_26] : memref<1x1xf32, #tpu.memory_space<vmem>>, vector<1x1xf32>
      tpu.vector_store %arg6[%c0_25, %c0_26], %41 {strides = array<i32>} : memref<1x1xf32, #tpu.memory_space<vmem>>, vector<1x1xf32>,
      %cst_27 = arith.constant 0.000000e+00 : f32
      %43 = vector.broadcast %cst_27 : f32 to vector<1x1xf32>
      %c0_28 = arith.constant 0 : index
      %c0_29 = arith.constant 0 : index
      %44 = vector.load %arg7[%c0_28, %c0_29] : memref<1x1xf32, #tpu.memory_space<vmem>>, vector<1x1xf32>
      tpu.vector_store %arg7[%c0_28, %c0_29], %43 {strides = array<i32>} : memref<1x1xf32, #tpu.memory_space<vmem>>, vector<1x1xf32>,
      %cst_30 = arith.constant 0.000000e+00 : f32
      %45 = vector.broadcast %cst_30 : f32 to vector<1x128xf32>
      %c0_31 = arith.constant 0 : index
      %c0_32 = arith.constant 0 : index
      %46 = vector.load %arg8[%c0_31, %c0_32] : memref<1x128xf32, #tpu.memory_space<vmem>>, vector<1x128xf32>
      tpu.vector_store %arg8[%c0_31, %c0_32], %45 {strides = array<i32>} : memref<1x128xf32, #tpu.memory_space<vmem>>, vector<1x128xf32>,
    } else {
    }
    %c0 = arith.constant 0 : index
    %c0_1 = arith.constant 0 : index
    %3 = vector.load %arg3[%c0, %c0_1] : memref<128x128xf32, #tpu.memory_space<vmem>>, vector<128x128xf32>
    %c0_2 = arith.constant 0 : index
    %c0_3 = arith.constant 0 : index
    %4 = vector.load %arg2[%c0_2, %c0_3] : memref<1x128xf32, #tpu.memory_space<vmem>>, vector<1x128xf32>
    %cst = arith.constant dense<0.000000e+00> : vector<1x128xf32>
    %5 = tpu.matmul %4, %3, %cst {dimension_numbers = #tpu.dot_dimension_numbers<[1], [1], [0], [0], [0, 0, 1, 0], [], []>} : vector<1x128xf32>, vector<128x128xf32>, vector<1x128xf32> -> vector<1x128xf32>
    %6 = tpu.iota {dimensions = array<i32: 1>} : vector<1x128xi32>
    %c128_i32 = arith.constant 128 : i32
    %7 = arith.muli %arg0, %c128_i32 : i32
    %8 = vector.broadcast %7 : i32 to vector<1x128xi32>
    %9 = arith.addi %8, %6 : vector<1x128xi32>
    %c300_i32 = arith.constant 300 : i32
    %10 = vector.broadcast %c300_i32 : i32 to vector<1x128xi32>
    %11 = arith.cmpi slt, %9, %10 : vector<1x128xi32>
    %cst_4 = arith.constant -1.000000e+30 : f32
    %12 = vector.broadcast %cst_4 : f32 to vector<1x128xf32>
    %13 = arith.select %11, %5, %12 : vector<1x128xi1>, vector<1x128xf32>
    %c0_5 = arith.constant 0 : index
    %c0_6 = arith.constant 0 : index
    %14 = vector.load %arg4[%c0_5, %c0_6] : memref<128x128xf32, #tpu.memory_space<vmem>>, vector<128x128xf32>
    %cst_7 = arith.constant dense<0.000000e+00> : vector<128x128xf32>
    %15 = tpu.matmul %3, %14, %cst_7 {dimension_numbers = #tpu.dot_dimension_numbers<[1], [0], [0], [1], [0, 0, 1, 1], [], []>} : vector<128x128xf32>, vector<128x128xf32>, vector<128x128xf32> -> vector<128x128xf32>
    %c0_8 = arith.constant 0 : index
    %c0_9 = arith.constant 0 : index
    %16 = vector.load %arg6[%c0_8, %c0_9] : memref<1x1xf32, #tpu.memory_space<vmem>>, vector<1x1xf32>
    %cst_10 = arith.constant dense<0xFF800000> : vector<1xf32>
    %17 = vector.multi_reduction <maximumf>, %13, %cst_10 [1] : vector<1x128xf32> to vector<1xf32>
    %18 = vector.shape_cast %17 : vector<1xf32> to vector<1x1xf32>
    %19 = arith.maximumf %16, %18 : vector<1x1xf32>
    %20 = arith.subf %16, %19 : vector<1x1xf32>
    %21 = math.exp %20 : vector<1x1xf32>
    %22 = vector.broadcast %19 : vector<1x1xf32> to vector<1x128xf32>
    %23 = arith.subf %13, %22 : vector<1x128xf32>
    %24 = math.exp %23 : vector<1x128xf32>
    %c0_11 = arith.constant 0 : index
    %c0_12 = arith.constant 0 : index
    %25 = vector.load %arg7[%c0_11, %c0_12] : memref<1x1xf32, #tpu.memory_space<vmem>>, vector<1x1xf32>
    %26 = arith.mulf %21, %25 : vector<1x1xf32>
    %cst_13 = arith.constant dense<0.000000e+00> : vector<1xf32>
    %27 = vector.multi_reduction <add>, %24, %cst_13 [1] : vector<1x128xf32> to vector<1xf32>
    %28 = vector.shape_cast %27 : vector<1xf32> to vector<1x1xf32>
    %29 = arith.addf %26, %28 : vector<1x1xf32>
    %c0_14 = arith.constant 0 : index
    %c0_15 = arith.constant 0 : index
    %30 = vector.load %arg7[%c0_14, %c0_15] : memref<1x1xf32, #tpu.memory_space<vmem>>, vector<1x1xf32>
    tpu.vector_store %arg7[%c0_14, %c0_15], %29 {strides = array<i32>} : memref<1x1xf32, #tpu.memory_space<vmem>>, vector<1x1xf32>,
    %c0_16 = arith.constant 0 : index
    %c0_17 = arith.constant 0 : index
    %31 = vector.load %arg8[%c0_16, %c0_17] : memref<1x128xf32, #tpu.memory_space<vmem>>, vector<1x128xf32>
    %32 = vector.broadcast %21 : vector<1x1xf32> to vector<1x128xf32>
    %33 = arith.mulf %32, %31 : vector<1x128xf32>
    %cst_18 = arith.constant dense<0.000000e+00> : vector<1x128xf32>
    %34 = tpu.matmul %24, %15, %cst_18 {dimension_numbers = #tpu.dot_dimension_numbers<[1], [0], [0], [1], [0, 0, 1, 1], [], []>} : vector<1x128xf32>, vector<128x128xf32>, vector<1x128xf32> -> vector<1x128xf32>
    %35 = arith.addf %33, %34 : vector<1x128xf32>
    %c0_19 = arith.constant 0 : index
    %c0_20 = arith.constant 0 : index
    %36 = vector.load %arg8[%c0_19, %c0_20] : memref<1x128xf32, #tpu.memory_space<vmem>>, vector<1x128xf32>
    tpu.vector_store %arg8[%c0_19, %c0_20], %35 {strides = array<i32>} : memref<1x128xf32, #tpu.memory_space<vmem>>, vector<1x128xf32>,
    %c0_21 = arith.constant 0 : index
    %c0_22 = arith.constant 0 : index
    %37 = vector.load %arg6[%c0_21, %c0_22] : memref<1x1xf32, #tpu.memory_space<vmem>>, vector<1x1xf32>
    tpu.vector_store %arg6[%c0_21, %c0_22], %19 {strides = array<i32>} : memref<1x1xf32, #tpu.memory_space<vmem>>, vector<1x1xf32>,
    %c2_i32 = arith.constant 2 : i32
    %38 = arith.cmpi eq, %arg0, %c2_i32 : i32
    %39 = arith.extui %38 : i1 to i32
    %c0_i32_23 = arith.constant 0 : i32
    %40 = arith.cmpi ne, %39, %c0_i32_23 : i32
    scf.if %40 {
      %c0_24 = arith.constant 0 : index
      %c0_25 = arith.constant 0 : index
      %41 = vector.load %arg7[%c0_24, %c0_25] : memref<1x1xf32, #tpu.memory_space<vmem>>, vector<1x1xf32>
      %42 = tpu.reciprocal %41 {approx = true} : vector<1x1xf32> -> vector<1x1xf32>
      %c0_26 = arith.constant 0 : index
      %c0_27 = arith.constant 0 : index
      %43 = vector.load %arg8[%c0_26, %c0_27] : memref<1x128xf32, #tpu.memory_space<vmem>>, vector<1x128xf32>
      %44 = vector.broadcast %42 : vector<1x1xf32> to vector<1x128xf32>
      %45 = arith.mulf %43, %44 : vector<1x128xf32>
      %c0_28 = arith.constant 0 : index
      %c0_29 = arith.constant 0 : index
      %46 = vector.load %arg1[%c0_28, %c0_29] : memref<1x128xf32, #tpu.memory_space<vmem>>, vector<1x128xf32>
      %47 = arith.addf %45, %46 : vector<1x128xf32>
      %c0_30 = arith.constant 0 : index
      %c0_31 = arith.constant 0 : index
      %48 = vector.load %arg5[%c0_30, %c0_31] : memref<1x128xf32, #tpu.memory_space<vmem>>, vector<1x128xf32>
      tpu.vector_store %arg5[%c0_30, %c0_31], %47 {strides = array<i32>} : memref<1x128xf32, #tpu.memory_space<vmem>>, vector<1x128xf32>,
    } else {
    }
    return
  }
  func.func @transform_0(%arg0: i32) -> (i32, i32) {
    %c0_i32 = arith.constant 0 : i32
    %c0_i32_0 = arith.constant 0 : i32
    %c0_i32_1 = arith.constant 0 : i32
    return %c0_i32, %c0_i32_0 : i32, i32
  }
  func.func @transform_1(%arg0: i32) -> (i32, i32) {
    %c0_i32 = arith.constant 0 : i32
    %c0_i32_0 = arith.constant 0 : i32
    %c0_i32_1 = arith.constant 0 : i32
    return %c0_i32, %c0_i32_0 : i32, i32
  }
  func.func @transform_2(%arg0: i32) -> (i32, i32) {
    %c0_i32 = arith.constant 0 : i32
    %c0_i32_0 = arith.constant 0 : i32
    return %arg0, %c0_i32 : i32, i32
  }
  func.func @transform_3(%arg0: i32) -> (i32, i32) {
    %c0_i32 = arith.constant 0 : i32
    %c0_i32_0 = arith.constant 0 : i32
    %c0_i32_1 = arith.constant 0 : i32
    return %c0_i32, %c0_i32_0 : i32, i32
  }
  func.func @transform_4(%arg0: i32) -> (i32, i32) {
    %c0_i32 = arith.constant 0 : i32
    %c0_i32_0 = arith.constant 0 : i32
    %c0_i32_1 = arith.constant 0 : i32
    return %c0_i32, %c0_i32_0 : i32, i32
  }
}

</mosaic_0001>

<bundles_post_ra>
// kernel: tpu_custom_call.1
= control target key start
LH: loop header
LB: loop body
LE: loop exit
PB: predicated region body
PF: predicated region fallthrough
CT: control target
= control target key end

     0   :  { %9 = vsyncpa [#allocation6], 0  ;;  %s1579_s0 = inlined_call_operand.hbm [shape: f32[1,128], index: 0, kind: input, shape index: {}]   ;;  %s1580_s1 = inlined_call_operand.vmem [shape: f32[1,128], index: 1, kind: input, shape index: {}]   ;;  %s1581_s2 = inlined_call_operand.hbm [shape: f32[384,128], index: 2, kind: input, shape index: {}]   ;;  %s1582_s3 = inlined_call_operand.hbm [shape: f32[128,128], index: 3, kind: input, shape index: {}]   ;;  %s1583_s4 = inlined_call_operand.hbm [shape: f32[1,128], index: 4, kind: output, shape index: {}]  }
   0x1   :  { %10 = vsyncpa [#allocation9], 0 }
   0x2   :  { %12 = vsyncpa [#allocation9 + $0x1], 0 }
   0x3   :  { %13 = vsyncpa [#allocation7], 0  ;;  %s1281_s15 = smov 0   ;;  %s1283_s16 = smov 0  }
   0x4   :  { %s1285_s17 = smov 0   ;;  %s1287_s18 = smov 0  }
   0x5 LB: > { %s1300_s19 = sadd.s32 4294967295, %s1241_s18   ;;  %s1303_s20 = sadd.s32 1, %s1241_s18   ;;  %s1241_s18 = sphi %s1287_s18, %s1604_s18   ;;  %s1237_s17 = sphi %s1285_s17, %s1603_s17   ;;  %s1233_s16 = sphi %s1283_s16, %s1602_s16   ;;  %s1229_s15 = sphi %s1281_s15, %s1601_s15  }
   0x6   : > { %s65_s21 = ssub.s32 %s1241_s18, %s1303_s20  ;;  %s68_s22 = sadd.s32 1, %s1237_s17 }
   0x7   : > { %p66_p0 = scmp.eq.s32.totalorder %s65_s21, 0  ;;  %p75_p1 = scmp.ne.s32.totalorder %s1237_s17, %s1233_s16 }
   0x8   : > { %p76_p2 = scmp.eq.s32.totalorder %s1241_s18, 0  ;;  %p81_p3 = scmp.ne.s32.totalorder %s1233_s16, %s1229_s15 }
   0x9   : > { %s1313_s23 = scalar_select %p66_p0, %s1237_s17, %s68_s22  }
   0xa   : > { %p1315_p4 = por %p76_p2, %p75_p1  ;;  %p1584_p5 = scmp.eq.s32.totalorder %s1300_s19, 0 }
   0xb   : > { %p707_p6 = scmp.ge.s32.totalorder %s1241_s18, 1  ;;  %p134_p7 = scmp.lt.s32.totalorder %s1241_s18, 4 }
   0xc   : > { %p1324_p8 = por %p1584_p5, %p81_p3  ;;  %s1243_s27 = smov [#allocation10]  }
   0xd   : > { %p1329_p10 = pnand %p707_p6, %p134_p7  ;;  %s160_s28 = sshll.u32 %s1243_s27, 4  ;;  %s161_s28 = int_to_ptr.vmem [resolvable:$true] %s160_s28 }
   0xe   : > { %s1589_s25 = scalar_select %p1324_p8, 1, 0 }
   0xf   : > { %s1590_s26 = scalar_select %p1329_p10, 1, 0 }
  0x10   : > { %p1012_p11 = pneg %p1329_p10  ;;  %p1025_p13 = scmp.lt.s32.totalorder %s1241_s18, 3 }
  0x11   : > { %s1083_s7 = scalar_lea.hbm %s1582_s3, 2048 }
  0x12   : > { %p1337_p12 = pnand %p1012_p11, %p1584_p5  ;;  %p1344_p0 = pnand %p1025_p13, %p1315_p4 }
  0x13   : > { %p1084_p1 = scmp.ne.s32.totalorder %s1582_s3, %s1083_s7  ;;  %p1090_p4 = scmp.lt.u32.totalorder %s1083_s7, %s1582_s3 }
  0x14   : > { %s1592_s30 = scalar_select %p1344_p0, 1, 0 }
  0x15   : > { %p1085_p2 = pneg %p1337_p12 }
  0x17   : > { %p1086_p3 = pnand %p1085_p2, %p1084_p1 }
  0x19   : > { %p1087_p6 = pneg %p1086_p3 }
  0x1b   : > { %p1092_p7 = pnand %p1090_p4, %p1087_p6 }
  0x1d   : > { %1095 = shalt.err (!%p1092_p7)
}
  0x1e   : > { %s1096_s12 = scalar_lea.vmem %s161_s28, 2048  ;;  %p1104_p5 = scmp.lt.s32.totalorder %s161_s28, %s161_s28 }
  0x1f   : > { %p1097_p11 = scmp.ne.s32.totalorder %s161_s28, %s1096_s12  ;;  %p1105_p8 = scmp.lt.s32.totalorder %s1096_s12, %s1096_s12 }
  0x21   : > { %p1099_p13 = pnand %p1097_p11, %p1085_p2  ;;  %p1106_p10 = por %p1105_p8, %p1104_p5 }
  0x23   : > { %p1100_p9 = pneg %p1099_p13 }
  0x25   : > { %p1107_p0 = pnand %p1106_p10, %p1100_p9 }
  0x27   : > { %1110 = shalt.err (!%p1107_p0)
}
  0x28   : > { %s1244_s13 = smov 128   ;;  %s1245_s14 = smov 8  }
  0x29   : > { %1018 = dma.hbm_to_vmem [thread:$0]  (!%p1337_p12), %s1582_s3, 2048, %s161_s28, [#allocation9], %s1244_s13, %s1244_s13, %s1245_s14  }
  0x2a   : > { %s1246_s22 = smov [#allocation5]   ;;  %s174_s27 = sand.u32 1, %s1241_s18  }
  0x2b   : > { %s147_s24 = sshll.u32 %s1246_s22, 4  ;;  %s1111_s7 = scalar_lea.hbm %s1579_s0, 16  ;;  %s148_s24 = int_to_ptr.vmem [resolvable:$true] %s147_s24 }
  0x2c   : > { %p1112_p5 = scmp.ne.s32.totalorder %s1579_s0, %s1111_s7  ;;  %p1118_p10 = scmp.lt.u32.totalorder %s1111_s7, %s1579_s0 }
  0x2e   : > { %p1114_p8 = pnand %p1112_p5, %p1085_p2 }
  0x30   : > { %p1115_p9 = pneg %p1114_p8 }
  0x32   : > { %p1120_p0 = pnand %p1118_p10, %p1115_p9 }
  0x34   : > { %1123 = shalt.err (!%p1120_p0)
}
  0x35   : > { %s1124_s28 = scalar_lea.vmem %s148_s24, 16  ;;  %s1131_s12 = scalar_lea.vmem %s148_s24, 32 }
  0x36   : > { %p1125_p1 = scmp.ne.s32.totalorder %s148_s24, %s1124_s28  ;;  %p1132_p4 = scmp.lt.s32.totalorder %s148_s24, %s148_s24 }
  0x37   : > { %p1133_p7 = scmp.lt.s32.totalorder %s1131_s12, %s1124_s28 }
  0x38   : > { %p1127_p3 = pnand %p1125_p1, %p1085_p2 }
  0x39   : > { %p1134_p11 = por %p1133_p7, %p1132_p4 }
  0x3a   : > { %p1128_p6 = pneg %p1127_p3 }
  0x3c   : > { %p1135_p13 = pnand %p1134_p11, %p1128_p6 }
  0x3e   : > { %1138 = shalt.err (!%p1135_p13)
}
  0x3f   : > { %1015 = dma.hbm_to_vmem [thread:$0]  (!%p1337_p12), %s1579_s0, 16, %s148_s24, [#allocation6]  }
  0x40   : > { %s176_s22 = sand.u32 1, %s1237_s17   ;;  %s725_s5 = sshll.u32 %s1241_s18, 11 }
  0x41   : > { %s711_s6 = sshll.u32 %s176_s22, 7  ;;  %s1399_s9 = scalar_lea.hbm %s1581_s2, %s725_s5 }
  0x42   : > { %s178_s29 = scalar_lea.vmem [#allocation8], %s711_s6  ;;  %s1403_s11 = scalar_lea.sflag [#allocation9], %s174_s27 }
  0x43   : > { %s185_s10 = sshll.u32 %s178_s29, 4  ;;  %s1139_s28 = scalar_lea.hbm %s1399_s9, 2048  ;;  %s1401_s10 = int_to_ptr.vmem [resolvable:$true] %s185_s10 }
  0x44   : > { %p1140_p12 = scmp.ne.s32.totalorder %s1399_s9, %s1139_s28  ;;  %p1593_p2 = scmp.ne.s32.totalorder %s1592_s30, 0 }
  0x45   : > { %s1144_s12 = scalar_lea.hbm %s1581_s2, 6144  ;;  %p1145_p10 = scmp.lt.u32.totalorder %s1399_s9, %s1581_s2 }
  0x46   : > { %p1141_p5 = pneg %p1593_p2  ;;  %p1146_p0 = scmp.lt.u32.totalorder %s1144_s12, %s1139_s28 }
  0x47   : > { %p1148_p3 = scmp.lt.u32.totalorder %s1139_s28, %s1399_s9 }
  0x48   : > { %p1142_p8 = pnand %p1141_p5, %p1140_p12  ;;  %p1147_p1 = por %p1146_p0, %p1145_p10 }
  0x4a   : > { %p1143_p9 = pneg %p1142_p8  ;;  %p1149_p6 = por %p1148_p3, %p1147_p1 }
  0x4c   : > { %p1150_p4 = pnand %p1149_p6, %p1143_p9 }
  0x4e   : > { %1153 = shalt.err (!%p1150_p4)
}
  0x4f   : > { %s1154_s27 = scalar_lea.vmem %s1401_s10, 2048  ;;  %s1247_s22 = smov [#allocation8]  }
  0x50   : > { %p1155_p7 = scmp.ne.s32.totalorder %s1401_s10, %s1154_s27  ;;  %s1159_s5 = sshll.u32 %s1247_s22, 4  ;;  %s1160_s5 = int_to_ptr.vmem [resolvable:$false] %s1159_s5 }
  0x51   : > { %s1161_s6 = scalar_lea.vmem %s1160_s5, 4096  ;;  %p1162_p12 = scmp.lt.s32.totalorder %s1401_s10, %s1160_s5 }
  0x52   : > { %p1157_p11 = pnand %p1155_p7, %p1141_p5  ;;  %p1163_p8 = scmp.lt.s32.totalorder %s1161_s6, %s1154_s27 }
  0x54   : > { %p1158_p13 = pneg %p1157_p11  ;;  %p1164_p10 = por %p1163_p8, %p1162_p12 }
  0x56   : > { %p1165_p0 = pnand %p1164_p10, %p1158_p13 }
  0x58   : > { %1168 = shalt.err (!%p1165_p0)
}
  0x59   : > { %1022 = dma.hbm_to_vmem [thread:$0]  (!%p1593_p2), %s1399_s9, 2048, %s1401_s10, %s1403_s11, %s1244_s13, %s1244_s13, %s1245_s14  }
  0x5a   : > { %p1594_p5 = scmp.ne.s32.totalorder %s1590_s26, 0 }
  0x5b   : > { %p1595_p9 = scmp.eq.s32.totalorder (!%p1594_p5), %s1300_s19, 0 }
  0x5c   : > { %197 = sbr.rel (%p1594_p5) target bundleno = 1010 (0x3f2), region = 36 }
  0x63   : > { %1212 = dma.done.wait (%p1595_p9), [#allocation6], 16   ;;  %p1596_p1 = pmov %p1595_p9 }
  0x64   : > { %s203_s30 = sand.u32 1, %s1300_s19   ;;  %s205_s7 = sand.u32 1, %s1233_s16  }
  0x65   : > { %1214 = vsyncadd (%p1596_p1), [#allocation6], 4294967280  ;;  %s716_s8 = sshll.u32 %s205_s7, 7  ;;  %s204_s29 = scalar_lea.sflag [#allocation9], %s203_s30 }
  0x66   : > { %s1442_s28 = scalar_lea.vmem [#allocation8], %s716_s8  ;;  %p1597_p3 = scmp.ne.s32.totalorder %s1589_s25, 0 }
  0x68   : > { %1216 = dma.done.wait (%p1597_p3), %s204_s29, 2048  }
  0x69   : > { %1218 = vsyncadd (%p1597_p3), %s204_s29, 4294965248  ;;  %p1598_p2 = pmov %p1596_p1 }
  0x6a   : > { %p1599_p6 = pmov %p1596_p1 }
  0x6b   : > { %1220 = dma.done.wait (%p1598_p2), [#allocation9], 2048  }
  0x6c   : > { %1222 = vsyncadd (%p1599_p6), [#allocation9], 4294965248  ;;  %p1600_p4 = scmp.ne.s32.totalorder %s1300_s19, 0 }
  0x6d   : > { %vm236_vm0 = vcmask (!%p1600_p4), 0   ;;  %v1248_v0 = vmov (!%p1600_p4), -1e+30   ;;  %v1249_v1 = vmov (!%p1600_p4), 0.0  }
  0x6e   : > { %235 = sbr.rel (%p1600_p4) target bundleno = 117 (0x75), region = 52  ;;  %237 = vst.msk [vmem:[#allocation2] sm:$0x1] (!%p1600_p4), %vm236_vm0, %v1248_v0  ;;  %238 = vst.msk [vmem:[#allocation3] sm:$0x1] (!%p1600_p4), %vm236_vm0, %v1249_v1 }
  0x6f   : > { %239 = vst [vmem:[#allocation4] sm:$0x1] (!%p1600_p4), %v1249_v1 }
  0x75 PF: > { %v240_v2 = vld [vmem:[%s1442_s28] sm:$0xff]  ;;  %v1456_v3 = vld [vmem:[%s1442_s28 + $0x8] sm:$0xff]  ;;  %v1250_v4 = vmov 0.0|0.0   ;;  %vm1251_vm1 = vmmov 0   ;;  %v1252_v6 = vmov 0.0   ;;  %v1464_v7 = vld [vmem:[%s1442_s28 + $0x10] sm:$0xff]  ;;  %v327_v53 = vlaneseq }
  0x76   : > { %918 = vmatprep.subr.bf16.mxu0 %v1250_v4  ;;  %v919_v5 = vpack.c.bf16 %v1456_v3, %v240_v2  ;;  %824 = vmatprep.mubr.msk.f32.mxu0 %vm1251_vm1, %v1252_v6  ;;  %v1467_v8 = vld [vmem:[%s1442_s28 + $0x18] sm:$0xff]  ;;  %v1473_v10 = vld [vmem:[%s1442_s28 + $0x20] sm:$0xff]  ;;  %v1476_v11 = vld [vmem:[%s1442_s28 + $0x28] sm:$0xff]  ;;  %s719_s13 = sshll.u32 %s1300_s19, 7  ;;  %vm496_vm3 = vcmask 1040384   ;;  %v1253_v61 = vmov 0  }
  0x77   : > { %859 = vmatprep.mubr.f32.mxu1 %v240_v2  ;;  %v922_v9 = vpack.c.bf16 %v1467_v8, %v1464_v7  ;;  %v925_v12 = vpack.c.bf16 %v1476_v11, %v1473_v10  ;;  %v1482_v13 = vld [vmem:[%s1442_s28 + $0x30] sm:$0xff]  ;;  %v1485_v14 = vld [vmem:[%s1442_s28 + $0x38] sm:$0xff]  ;;  %v1491_v16 = vld [vmem:[%s1442_s28 + $0x40] sm:$0xff]  ;;  %v328_v54 = vand.u32 127, %v327_v53  ;;  %v330_v55 = vstv %s719_s13  ;;  %1074 = vset.pattern.permute.xlu0 %v1253_v61  ;;  %p720_p7 = scmp.ne.s32.totalorder %s1300_s19, 2 }
  0x78   : > { %920 = vmatpush3.bf16.xpose.msra.mxu0 %v919_v5  ;;  %v928_v15 = vpack.c.bf16 %v1485_v14, %v1482_v13  ;;  %v1494_v17 = vld [vmem:[%s1442_s28 + $0x48] sm:$0xff]  ;;  %v1500_v19 = vld [vmem:[%s1442_s28 + $0x50] sm:$0xff]  ;;  %v1503_v20 = vld [vmem:[%s1442_s28 + $0x58] sm:$0xff]  ;;  %1075 = vset.pattern.permute.xlu1 %v1253_v61  ;;  %vm522_vm4 = vcmask 0  }
  0x79   : > { %921 = vmatprep.subr.bf16.mxu0 %v1250_v4  ;;  %v931_v18 = vpack.c.bf16 %v1494_v17, %v1491_v16  ;;  %v934_v21 = vpack.c.bf16 %v1503_v20, %v1500_v19  ;;  %v252_v22 = vld [vmem:[%s1442_s28 + $0x60] sm:$0xff]  ;;  %v253_v23 = vld [vmem:[%s1442_s28 + $0x68] sm:$0xff]  ;;  %v254_v25 = vld [vmem:[%s1442_s28 + $0x70] sm:$0xff]  ;;  %v331_v56 = vadd.s32 %v330_v55, %v328_v54 }
  0x7a   : > { %v937_v24 = vpack.c.bf16 %v253_v23, %v252_v22  ;;  %v255_v26 = vld [vmem:[%s1442_s28 + $0x78] sm:$0xff]  ;;  %v334_v29 = vld [vmem:[#allocation10] sm:$0xff]  ;;  %v335_v30 = vld [vmem:[#allocation10 + $0x8] sm:$0xff] }
  0x7b   : > { %v940_v27 = vpack.c.bf16 %v255_v26, %v254_v25  ;;  %v256_v28 = vld [vmem:[%s1580_s1] sm:$0x1]  ;;  %v336_v31 = vld [vmem:[#allocation10 + $0x10] sm:$0xff]  ;;  %v942_v32 = vpack.c.bf16 %v335_v30, %v334_v29  ;;  %v338_v35 = vld [vmem:[#allocation10 + $0x20] sm:$0xff]  ;;  %vm332_vm2 = vcmp.lt.s32.totalorder %v331_v56, 300 }
  0x7c   : > { %v337_v33 = vld [vmem:[#allocation10 + $0x18] sm:$0xff]  ;;  %v339_v36 = vld [vmem:[#allocation10 + $0x28] sm:$0xff]  ;;  %v340_v38 = vld [vmem:[#allocation10 + $0x30] sm:$0xff] }
  0x7d   : > { %v946_v34 = vpack.c.bf16 %v337_v33, %v336_v31  ;;  %943 = vmatprep.subr.bf16.mxu1 %v942_v32  ;;  %v950_v37 = vpack.c.bf16 %v339_v36, %v338_v35  ;;  %v341_v39 = vld [vmem:[#allocation10 + $0x38] sm:$0xff]  ;;  %v342_v41 = vld [vmem:[#allocation10 + $0x40] sm:$0xff]  ;;  %v343_v42 = vld [vmem:[#allocation10 + $0x48] sm:$0xff] }
  0x7e   : > { %945 = vmatpush3.bf16.msra.mxu1 %v942_v32  ;;  %v954_v40 = vpack.c.bf16 %v341_v39, %v340_v38  ;;  %v958_v43 = vpack.c.bf16 %v343_v42, %v342_v41  ;;  %v344_v44 = vld [vmem:[#allocation10 + $0x50] sm:$0xff]  ;;  %v345_v45 = vld [vmem:[#allocation10 + $0x58] sm:$0xff]  ;;  %v346_v47 = vld [vmem:[#allocation10 + $0x60] sm:$0xff] }
  0x7f   : > { %947 = vmatprep.subr.bf16.mxu1 %v946_v34  ;;  %v962_v46 = vpack.c.bf16 %v345_v45, %v344_v44  ;;  %v347_v48 = vld [vmem:[#allocation10 + $0x68] sm:$0xff]  ;;  %v348_v50 = vld [vmem:[#allocation10 + $0x70] sm:$0xff]  ;;  %v349_v51 = vld [vmem:[#allocation10 + $0x78] sm:$0xff] }
  0x80   : > { %923 = vmatpush3.bf16.xpose.msra.mxu0 %v922_v9  ;;  %v966_v49 = vpack.c.bf16 %v347_v48, %v346_v47  ;;  %v970_v52 = vpack.c.bf16 %v349_v51, %v348_v50  ;;  %v524_v42 = vld [vmem:[#allocation4] sm:$0x1]  ;;  %v1254_v48 = vmov (!%p720_p7), 0  }
  0x81   : > { %924 = vmatprep.subr.bf16.mxu0 %v1250_v4 }
  0x82   : > { %949 = vmatpush3.bf16.msra.mxu1 %v946_v34 }
  0x83   : > { %951 = vmatprep.subr.bf16.mxu1 %v950_v37 }
  0x86   : > { %953 = vmatpush3.bf16.msra.mxu1 %v950_v37  ;;  %v516_v37 = vld [vmem:[#allocation3] sm:$0x1] }
  0x87   : > { %955 = vmatprep.subr.bf16.mxu1 %v954_v40 }
  0x88   : > { %926 = vmatpush3.bf16.xpose.msra.mxu0 %v925_v12 }
  0x89   : > { %927 = vmatprep.subr.bf16.mxu0 %v1250_v4 }
  0x8a   : > { %957 = vmatpush3.bf16.msra.mxu1 %v954_v40 }
  0x8b   : > { %959 = vmatprep.subr.bf16.mxu1 %v958_v43 }
  0x8e   : > { %961 = vmatpush3.bf16.msra.mxu1 %v958_v43 }
  0x8f   : > { %963 = vmatprep.subr.bf16.mxu1 %v962_v46 }
  0x90   : > { %929 = vmatpush3.bf16.xpose.msra.mxu0 %v928_v15 }
  0x91   : > { %930 = vmatprep.subr.bf16.mxu0 %v1250_v4 }
  0x92   : > { %965 = vmatpush3.bf16.msra.mxu1 %v962_v46 }
  0x93   : > { %967 = vmatprep.subr.bf16.mxu1 %v966_v49 }
  0x96   : > { %969 = vmatpush3.bf16.msra.mxu1 %v966_v49 }
  0x97   : > { %971 = vmatprep.subr.bf16.mxu1 %v970_v52 }
  0x98   : > { %932 = vmatpush3.bf16.xpose.msra.mxu0 %v931_v18 }
  0x99   : > { %933 = vmatprep.subr.bf16.mxu0 %v1250_v4 }
  0x9a   : > { %973 = vmatpush3.bf16.msra.mxu1 %v970_v52 }
  0x9b   : > { %974 = vmatprep.subr.bf16.mxu1 %v1250_v4 }
  0x9d   : > { %860 = vmatmul.mubr.f32.vlgmr.msra.gmra.mrb[0].mxu1 %v1456_v3 }
  0x9e   : > { %862 = vmatprep.mubr.f32.mxu1 %v1464_v7 }
  0xa0   : > { %935 = vmatpush3.bf16.xpose.msra.mxu0 %v934_v21 }
  0xa1   : > { %936 = vmatprep.subr.bf16.mxu0 %v1250_v4  ;;  %863 = vmatmul.mubr.f32.gmra.mrb[2].mxu1 %v1467_v8 }
  0xa2   : > { %865 = vmatprep.mubr.f32.mxu1 %v1473_v10 }
  0xa5   : > { %866 = vmatmul.mubr.f32.gmra.mrb[4].mxu1 %v1476_v11 }
  0xa6   : > { %868 = vmatprep.mubr.f32.mxu1 %v1482_v13 }
  0xa8   : > { %938 = vmatpush3.bf16.xpose.msra.mxu0 %v937_v24 }
  0xa9   : > { %939 = vmatprep.subr.bf16.mxu0 %v1250_v4  ;;  %869 = vmatmul.mubr.f32.gmra.mrb[6].mxu1 %v1485_v14  ;;  %v495_v14 = vld [vmem:[#allocation2] sm:$0x1] }
  0xaa   : > { %871 = vmatprep.mubr.f32.mxu1 %v1491_v16 }
  0xad   : > { %872 = vmatmul.mubr.f32.gmra.mrb[8].mxu1 %v1494_v17 }
  0xae   : > { %874 = vmatprep.mubr.f32.mxu1 %v1500_v19 }
  0xb0   : > { %941 = vmatpush3.bf16.xpose.msra.mxu0 %v940_v27  ;;  %v510_v27 = vshrl.u32 %v327_v53, 7  ;;  %v625_v53 = vld [vmem:[#allocation5] sm:$0x1] (!%p720_p7) }
  0xb1   : > { %875 = vmatmul.mubr.f32.gmra.mrb[10].mxu1 %v1503_v20 }
  0xb2   : > { %877 = vmatprep.mubr.f32.mxu1 %v252_v22 }
  0xb5   : > { %878 = vmatmul.mubr.f32.gmra.mrb[12].mxu1 %v253_v23 }
  0xb6   : > { %880 = vmatprep.mubr.f32.mxu1 %v254_v25 }
  0xb7   : > { %825 = vmatmul.mubr.f32.vlgmr.msra.gmra.mrb[0].mxu0 %v256_v28  ;;  %v511_v28 = vsub.s32 0, %v510_v27 }
  0xb9   : > { %881 = vmatmul.mubr.f32.gmra.mrb[14].mxu1 %v255_v26 }
  0xba   : > { %915 = vmatprep.mubr.msk.f32.mxu1 %vm1251_vm1, %v1252_v6 }
 0x170   : > { %v861_v62 = vpop.f32.mrb[0].mxu1 }
 0x171   : > { %v416_v63 = vpop.f32.mrb[1].mxu1 }
 0x172   : > { %v975_v0 = vpack.c.bf16 %v861_v62, %v416_v63 }
 0x174   : > { %v864_v1 = vpop.f32.mrb[2].mxu1  ;;  %976 = vmatpush3.bf16.msra.mxu1 %v975_v0 }
 0x175   : > { %v426_v2 = vpop.f32.mrb[3].mxu1  ;;  %977 = vmatprep.subr.bf16.mxu1 %v1250_v4 }
 0x176   : > { %v978_v3 = vpack.c.bf16 %v864_v1, %v426_v2 }
 0x178   : > { %v867_v5 = vpop.f32.mrb[4].mxu1  ;;  %979 = vmatpush3.bf16.msra.mxu1 %v978_v3 }
 0x179   : > { %v436_v6 = vpop.f32.mrb[5].mxu1  ;;  %980 = vmatprep.subr.bf16.mxu1 %v1250_v4 }
 0x17a   : > { %v981_v7 = vpack.c.bf16 %v867_v5, %v436_v6 }
 0x17c   : > { %v870_v8 = vpop.f32.mrb[6].mxu1  ;;  %982 = vmatpush3.bf16.msra.mxu1 %v981_v7 }
 0x17d   : > { %v446_v9 = vpop.f32.mrb[7].mxu1  ;;  %983 = vmatprep.subr.bf16.mxu1 %v1250_v4 }
 0x17e   : > { %v984_v10 = vpack.c.bf16 %v870_v8, %v446_v9 }
 0x180   : > { %v873_v11 = vpop.f32.mrb[8].mxu1  ;;  %985 = vmatpush3.bf16.msra.mxu1 %v984_v10 }
 0x181   : > { %v456_v12 = vpop.f32.mrb[9].mxu1  ;;  %986 = vmatprep.subr.bf16.mxu1 %v1250_v4 }
 0x182   : > { %v987_v13 = vpack.c.bf16 %v873_v11, %v456_v12 }
 0x184   : > { %988 = vmatpush3.bf16.msra.mxu1 %v987_v13  ;;  %v876_v18 = vpop.f32.mrb[10].mxu1 }
 0x185   : > { %989 = vmatprep.subr.bf16.mxu1 %v1250_v4  ;;  %v466_v19 = vpop.f32.mrb[11].mxu1 }
 0x186   : > { %v990_v20 = vpack.c.bf16 %v876_v18, %v466_v19 }
 0x188   : > { %v879_v21 = vpop.f32.mrb[12].mxu1  ;;  %991 = vmatpush3.bf16.msra.mxu1 %v990_v20 }
 0x189   : > { %v476_v22 = vpop.f32.mrb[13].mxu1  ;;  %992 = vmatprep.subr.bf16.mxu1 %v1250_v4 }
 0x18a   : > { %v323_v57 = vpop.f32.mrb[0].mxu0  ;;  %v993_v23 = vpack.c.bf16 %v879_v21, %v476_v22 }
 0x18b   : > { %v333_v58 = vsel %vm332_vm2, %v323_v57, -1e+30  ;;  %v826_v59 = vpop.f32.mrb[1].mxu0 }
 0x18c   : > { %v497_v60 = vsel %vm496_vm3, %v333_v58, -inf  ;;  %v882_v24 = vpop.f32.mrb[14].mxu1  ;;  %994 = vmatpush3.bf16.msra.mxu1 %v993_v23 }
 0x18d   : > { %498 = vmax.xlane.f32.xlu0 %v497_v60  ;;  %v486_v25 = vpop.f32.mrb[15].mxu1  ;;  %995 = vmatprep.subr.bf16.mxu1 %v1250_v4 }
 0x18e   : > { %v996_v26 = vpack.c.bf16 %v882_v24, %v486_v25 }
 0x190   : > { %997 = vmatpush3.bf16.msra.mxu1 %v996_v26 }
 0x21a   : > { %v499_v15 = vpop.xlane.xlu0 %498 }
 0x21b   : > { %v500_v16 = vmax.f32 %v495_v14, %v499_v15 }
 0x21d   : > { %v501_v17 = vsub.f32 %v495_v14, %v500_v16  ;;  %607 = vst.msk [vmem:[#allocation2] sm:$0x1] %vm522_vm4, %v500_v16  ;;  %506 = vperm.xlu0 %1074, %v500_v16  }
 0x21f   : > { %v502_v35 = vmul.f32 1.442695, %v501_v17 }
 0x221   : > { %1080 = vset.pattern.permute.xlu0 (!%p720_p7), %v1254_v48 }
 0x29c   : > { %v507_v29 = vpop.permute.xlu0 %506 }
 0x29d   : > { %v512_v30 = vrot.slane %v507_v29, %v511_v28 }
 0x29f   : > { %v513_v31 = vsub.f32 %v333_v58, %v512_v30 }
 0x2a1   : > { %v514_v32 = vmul.f32 1.442695, %v513_v31 }
 0x2a3   : > { %1076 = vpow2.f32 %v514_v32 }
 0x2a4   : > { %1078 = vpow2.f32 %v502_v35 }
 0x2ad   : > { %v1077_v33 = vpop.eup %1076 }
 0x2ae   : > { %916 = vmatmul.mubr.f32.vlgmr.msra.gmra.mrb[16].mxu1 %v1077_v33  ;;  %v518_v34 = vsel %vm496_vm3, %v1077_v33, 0.0  ;;  %v1079_v36 = vpop.eup %1078 }
 0x2af   : > { %519 = vadd.xlane.f32.xlu1 %v518_v34  ;;  %v517_v38 = vmul.f32 %v1079_v36, %v516_v37 }
 0x2c0   : > { %527 = vperm.xlu1 %1075, %v1079_v36  }
 0x33c   : > { %v520_v4 = vpop.xlane.xlu1 %519 }
 0x33d   : > { %v521_v39 = vadd.f32 %v520_v4, %v517_v38 }
 0x33f   : > { %523 = vst.msk [vmem:[#allocation3] sm:$0x1] %vm522_vm4, %v521_v39 }
 0x340   : > { %v528_v40 = vpop.permute.xlu1 %527 }
 0x341   : > { %v533_v41 = vrot.slane %v528_v40, %v511_v28 }
 0x343   : > { %v534_v43 = vmul.f32 %v533_v41, %v524_v42 }
 0x346   : > { %v612_v47 = vld [vmem:[#allocation3] sm:$0x1] (!%p720_p7) }
 0x347   : > { %1081 = vrcp.f32 (!%p720_p7), %v612_v47 }
 0x351   : > { %v1082_v49 = vpop.eup (!%p720_p7), %1081 }
 0x352   : > { %617 = vperm.xlu0 (!%p720_p7), %1080, %v1082_v49  }
 0x37e   : > { %611 = sbr.rel (%p720_p7) target bundleno = 985 (0x3d9), region = 56 }
 0x381   : > { %v601_v44 = vpop.f32.mrb[16].mxu1 }
 0x382   : > { %v605_v45 = vadd.f32 %v601_v44, %v534_v43  ;;  %v917_v46 = vpop.f32.mrb[17].mxu1 }
 0x384   : > { %606 = vst [vmem:[#allocation4] sm:$0x1] %v605_v45 }
 0x38b   : > { %v614_v50 = vld [vmem:[#allocation4] sm:$0x1] }
 0x3d1   : > { %v618_v51 = vpop.permute.xlu0 %617 }
 0x3d2   : > { %v623_v52 = vrot.slane %v618_v51, %v511_v28 }
 0x3d4   : > { %v624_v54 = vmul.f32 %v623_v52, %v614_v50 }
 0x3d6   : > { %v626_v55 = vadd.f32 %v625_v53, %v624_v54 }
 0x3d8   : > { %627 = vst [vmem:[#allocation11] sm:$0x1] %v626_v55 }
 0x3d9 PF: > { %p1028_p11 = scmp.eq.s32.totalorder %s1300_s19, 2  ;;  %s1255_s14 = smov [#allocation11]  }
 0x3da   : > { %s635_s9 = sshll.u32 %s1255_s14, 4  ;;  %s636_s9 = int_to_ptr.vmem [resolvable:$true] %s635_s9 }
 0x3db   : > { %s1169_s10 = scalar_lea.vmem %s636_s9, 16  ;;  %s1175_s11 = scalar_lea.vmem %s636_s9, 32 }
 0x3dc   : > { %p1170_p13 = scmp.ne.s32.totalorder %s636_s9, %s1169_s10  ;;  %p1176_p10 = scmp.lt.s32.totalorder %s636_s9, %s636_s9 }
 0x3dd   : > { %p1177_p0 = scmp.lt.s32.totalorder %s1175_s11, %s1169_s10 }
 0x3de   : > { %p1171_p12 = pnand %p1170_p13, %p1028_p11 }
 0x3df   : > { %p1178_p5 = por %p1177_p0, %p1176_p10 }
 0x3e0   : > { %p1172_p8 = pneg %p1171_p12 }
 0x3e2   : > { %p1179_p9 = pnand %p1178_p5, %p1172_p8 }
 0x3e4   : > { %1182 = shalt.err (!%p1179_p9)
}
 0x3e5   : > { %s1183_s12 = scalar_lea.hbm %s1583_s4, 16 }
 0x3e6   : > { %p1184_p1 = scmp.ne.s32.totalorder %s1583_s4, %s1183_s12  ;;  %p1189_p6 = scmp.lt.u32.totalorder %s1183_s12, %s1583_s4 }
 0x3e8   : > { %p1185_p3 = pnand %p1184_p1, %p1028_p11 }
 0x3ea   : > { %p1186_p2 = pneg %p1185_p3 }
 0x3ec   : > { %p1191_p4 = pnand %p1189_p6, %p1186_p2 }
 0x3ee   : > { %1194 = shalt.err (!%p1191_p4)
}
 0x3ef   : > { %1009 = dma.vmem_to_hbm [thread:$0]  (%p1028_p11), %s636_s9, 16, %s1583_s4, [#allocation7]  }
 0x3f0   : > { %1224 = dma.done.wait (%p1028_p11), [#allocation7], 16  }
 0x3f1   : > { %1226 = vsyncadd (%p1028_p11), [#allocation7], 4294967280 }
 0x3f2 PF: > { %p16_p7 = scmp.ge.s32.totalorder %s1303_s20, 5   ;;  %s1601_s15 = smov %s1233_s16 }
 0x3f3   : > { %s1602_s16 = smov %s1237_s17  ;;  %s1603_s17 = smov %s1313_s23 }
 0x3f4   : > { %s1604_s18 = smov %s1303_s20  ;;  %18 = sbr.rel (!%p16_p7) target bundleno = 5 (0x5), region = 90 }
 0x3fb   :  { %648 = vsyncpa [#allocation6], 1 }
 0x3fc   :  { %650 = vsyncpa [#allocation6 + $0x1], 1 }
 0x3fd   :  { %651 = vsyncpa [#allocation9], 1 }
 0x3fe   :  { %653 = vsyncpa [#allocation9 + $0x1], 1 }
 0x3ff   :  { %654 = vsyncpa [#allocation7], 1 }
 0x400   :  { %656 = vsyncpa [#allocation7 + $0x1], 1 }

</bundles_post_ra>
